<compile_context>
chip_gen: v6e
topology: v6e:2x2x1
jax: 0.10.0
libtpu: 0.0.40
codegen_flags: <defaults>
</compile_context>

<pallas_src>
import jax
import jax.numpy as jnp
from jax.experimental import pallas as pl
from jax.experimental.pallas import tpu as pltpu

_LANES = 512            # lane-dense row width: wide contiguous DMAs, unmasked vst
_SUBLANES = 8
_MAX_TILE_ROWS = 1024   # (1024, 512) f32 = 2 MiB per block
_MIN_GRID_STEPS = 4     # keep a multi-step "parallel" grid for v7x's 2 TCs
# Below this many elements the pallas_call dispatch overhead dominates; let XLA
# fuse the handful of VPU/EUP ops instead (re-tuned per review).
_MIN_PALLAS_ELEMS = 256 * 1024


def _round_up(v, m):
    return ((v + m - 1) // m) * m


def _ids_kernel(params_ref, x_ref, o_ref):
    # params_ref is a (2,) f32 array in SMEM holding [w, b].
    w = params_ref[0]
    b = params_ref[1]
    z = x_ref[...] * w + b                  # elementwise affine on the VPU
    # Exact, numerically stable sigmoid; exp goes to the EUP slot (free filler
    # for an HBM-bound kernel).  TODO(synk): if a v5e bundle ever shows the
    # VPU/EUP slot binding, switch to pl.reciprocal(1 + exp(-z), approx=True).
    o_ref[...] = 1.0 / (1.0 + jnp.exp(-z))


def _ids_pallas(x_flat, params):
    """Lane-dense sigmoid(w * x + b) over a flat f32 vector of length n."""
    n = x_flat.shape[0]
    rows = pl.cdiv(n, _LANES)
    padded = rows * _LANES

    # Pad only the last partial lane-row (< _LANES elements).  For lane-aligned
    # n this is a pure reshape: no pad op and no trailing slice at all.
    if padded == n:
        x2d = x_flat.reshape(rows, _LANES)
    else:
        x2d = jnp.pad(x_flat, (0, padded - n)).reshape(rows, _LANES)

    # Block rows: as large as possible (1-4 MiB blocks) but capped so the grid
    # keeps >= _MIN_GRID_STEPS steps (v7x TC sharding), and a multiple of 8
    # (sublane granule) unless the whole array is smaller than that.
    tile_r = min(
        rows,
        _MAX_TILE_ROWS,
        max(_SUBLANES, _round_up(pl.cdiv(rows, _MIN_GRID_STEPS), _SUBLANES)),
    )
    grid = (pl.cdiv(rows, tile_r),)   # ragged final block is masked by Pallas

    out2d = pl.pallas_call(
        _ids_kernel,
        out_shape=jax.ShapeDtypeStruct((rows, _LANES), jnp.float32),
        grid=grid,
        in_specs=[
            pl.BlockSpec(memory_space=pltpu.MemorySpace.SMEM),   # (2,) [w, b]
            pl.BlockSpec((tile_r, _LANES), lambda i: (i, 0)),    # lane-dense x
        ],
        out_specs=pl.BlockSpec((tile_r, _LANES), lambda i: (i, 0)),
        compiler_params=pltpu.CompilerParams(
            dimension_semantics=("parallel",),        # shard row-blocks over TCs
            vmem_limit_bytes=32 * 1024 * 1024,        # explicit headroom (v5e)
        ),
    )(params, x2d)

    y_flat = out2d.reshape(padded)
    # Trailing slice exists only when n is not lane-aligned; it fuses with the
    # caller's reshape/squeeze into a single consumer op.
    return y_flat if padded == n else y_flat[:n]


def ids_model_forward(x, weight, bias, *, force_pallas=False):
    """IDSModel.forward: sigmoid(x @ W.T + b).squeeze().

    x: (N, 1) float32.  weight: (1, 1).  bias: (1,).
    Returns (N,) (or a 0-d array if N == 1, matching torch .squeeze()).
    """
    x = jnp.asarray(x, jnp.float32)
    w = jnp.asarray(weight, jnp.float32).reshape(())
    b = jnp.asarray(bias, jnp.float32).reshape(())

    # Linear(1, 1) is a scalar affine map, so flattening batch dims is exact.
    x_flat = x.reshape(-1)
    n = x_flat.shape[0]

    if force_pallas or n >= _MIN_PALLAS_ELEMS:
        params = jnp.stack([w, b])        # flat (2,) f32 -> 1-D SMEM operand
        y_flat = _ids_pallas(x_flat, params)
    else:
        # Small batch: kernel dispatch overhead dominates; XLA fusion wins.
        y_flat = jax.nn.sigmoid(x_flat * w + b)

    # torch .squeeze(): drop all size-1 dims of the (N, 1) Linear output.
    return jnp.squeeze(y_flat.reshape(x.shape))


def ids_model_reference(x, weight, bias):
    return jax.nn.sigmoid(x @ weight.T + bias).squeeze()


if __name__ == "__main__":
    key = jax.random.PRNGKey(0)
    kx, kw, kb, kx2, kx3 = jax.random.split(key, 5)

    # Deterministic synthetic Linear(1, 1) params (mimics PyTorch uniform(-1, 1)
    # init range for fan_in=1; not loaded from any checkpoint).
    weight = jax.random.uniform(kw, (1, 1), minval=-1.0, maxval=1.0, dtype=jnp.float32)
    bias = jax.random.uniform(kb, (1,), minval=-1.0, maxval=1.0, dtype=jnp.float32)

    # 1) Small, module-consistent batch (N=8, in_features=1), forced through the
    #    Pallas kernel: a single (1, 512) block with a tiny tail pad.
    x_small = jax.random.normal(kx, (8, 1), dtype=jnp.float32)
    out_small = ids_model_forward(x_small, weight, bias, force_pallas=True)
    jax.block_until_ready(out_small)
    ref_small = ids_model_reference(x_small, weight, bias)
    assert out_small.shape == (8,), out_small.shape
    assert jnp.allclose(out_small, ref_small, atol=1e-5, rtol=1e-5)

    # 2) Lane-aligned batch (N = 8 * 512): exercises the zero-pad / zero-slice
    #    fast path (pure reshape in, pure reshape out).
    x_aligned = jax.random.normal(kx3, (8 * _LANES, 1), dtype=jnp.float32)
    out_aligned = ids_model_forward(x_aligned, weight, bias, force_pallas=True)
    jax.block_until_ready(out_aligned)
    ref_aligned = ids_model_reference(x_aligned, weight, bias)
    assert out_aligned.shape == (8 * _LANES,), out_aligned.shape
    assert jnp.allclose(out_aligned, ref_aligned, atol=1e-5, rtol=1e-5)

    # 3) Larger non-aligned batch exercising the multi-step "parallel" grid,
    #    the cdiv-sized ragged final row-block, and the tail-row pad.
    n_big = 300_037
    x_big = jax.random.normal(kx2, (n_big, 1), dtype=jnp.float32)
    out_big = ids_model_forward(x_big, weight, bias)
    jax.block_until_ready(out_big)
    ref_big = ids_model_reference(x_big, weight, bias)
    assert out_big.shape == (n_big,), out_big.shape
    assert jnp.allclose(out_big, ref_big, atol=1e-5, rtol=1e-5)

    print("KERNEL_OK")
</pallas_src>

<mosaic_0001>
module attributes {stable_mosaic.version = 11 : i64} {
  func.func @_ids_kernel(%arg0: i32, %arg1: memref<2xf32, #tpu.memory_space<smem>>, %arg2: memref<1x512xf32, #tpu.memory_space<vmem>>, %arg3: memref<1x512xf32, #tpu.memory_space<vmem>>) attributes {dimension_semantics = [#tpu.dimension_semantics<parallel>], iteration_bounds = array<i64: 1>, scalar_prefetch = 0 : i64, scratch_operands = 0 : i64, tpu.core_type = #tpu.core_type<tc>, window_params = [{transform_indices = @transform_0, window_bounds = array<i64: 2>}, {transform_indices = @transform_1, window_bounds = array<i64: 1, 512>}, {transform_indices = @transform_2, window_bounds = array<i64: 1, 512>}]} {
    %c0 = arith.constant 0 : index
    %0 = memref.load %arg1[%c0] : memref<2xf32, #tpu.memory_space<smem>>
    %c1 = arith.constant 1 : index
    %1 = memref.load %arg1[%c1] : memref<2xf32, #tpu.memory_space<smem>>
    %c0_0 = arith.constant 0 : index
    %c0_1 = arith.constant 0 : index
    %2 = vector.load %arg2[%c0_0, %c0_1] : memref<1x512xf32, #tpu.memory_space<vmem>>, vector<1x512xf32>
    %3 = vector.broadcast %0 : f32 to vector<1x512xf32>
    %4 = arith.mulf %2, %3 : vector<1x512xf32>
    %5 = vector.broadcast %1 : f32 to vector<1x512xf32>
    %6 = arith.addf %4, %5 : vector<1x512xf32>
    %cst = arith.constant 0.000000e+00 : f32
    %7 = vector.broadcast %cst : f32 to vector<1x512xf32>
    %8 = arith.subf %7, %6 : vector<1x512xf32>
    %9 = math.exp %8 : vector<1x512xf32>
    %cst_2 = arith.constant 1.000000e+00 : f32
    %10 = vector.broadcast %cst_2 : f32 to vector<1x512xf32>
    %11 = arith.addf %10, %9 : vector<1x512xf32>
    %cst_3 = arith.constant 1.000000e+00 : f32
    %12 = vector.broadcast %cst_3 : f32 to vector<1x512xf32>
    %13 = arith.divf %12, %11 : vector<1x512xf32>
    %c0_4 = arith.constant 0 : index
    %c0_5 = arith.constant 0 : index
    %14 = vector.load %arg3[%c0_4, %c0_5] : memref<1x512xf32, #tpu.memory_space<vmem>>, vector<1x512xf32>
    tpu.vector_store %arg3[%c0_4, %c0_5], %13 {strides = array<i32>} : memref<1x512xf32, #tpu.memory_space<vmem>>, vector<1x512xf32>,
    return
  }
  func.func @transform_0(%arg0: i32) -> i32 {
    %c0_i32 = arith.constant 0 : i32
    %c0_i32_0 = arith.constant 0 : i32
    return %c0_i32 : i32
  }
  func.func @transform_1(%arg0: i32) -> (i32, i32) {
    %c0_i32 = arith.constant 0 : i32
    %c0_i32_0 = arith.constant 0 : i32
    return %arg0, %c0_i32 : i32, i32
  }
  func.func @transform_2(%arg0: i32) -> (i32, i32) {
    %c0_i32 = arith.constant 0 : i32
    %c0_i32_0 = arith.constant 0 : i32
    return %arg0, %c0_i32 : i32, i32
  }
}

</mosaic_0001>

<bundles_post_ra>
// kernel: tpu_custom_call.1
= control target key start
LH: loop header
LB: loop body
LE: loop exit
PB: predicated region body
PF: predicated region fallthrough
CT: control target
= control target key end

     0   :  { %7 = vsyncpa [#allocation5], 0  ;;  %s158_s0 = inlined_call_operand.hbm [shape: f32[2], index: 0, kind: input, shape index: {}]   ;;  %s159_s1 = inlined_call_operand.hbm [shape: f32[1,512], index: 1, kind: input, shape index: {}]   ;;  %s160_s2 = inlined_call_operand.hbm [shape: f32[1,512], index: 2, kind: output, shape index: {}]  }
   0x1   :  { %8 = vsyncpa [#allocation3], 0 }
   0x2   :  { %9 = vsyncpa [#allocation4], 0  ;;  %s131_s9 = smov [#allocation2]   ;;  %s132_s12 = smov [#allocation6]  }
   0x3   :  { %17 = dma.hbm_to_smem %s158_s0, 16, %s131_s9, [#allocation5]  }
   0x4   :  { %s24_s13 = sshll.u32 %s132_s12, 4  ;;  %s25_s13 = int_to_ptr.vmem [resolvable:$true] %s24_s13 }
   0x5   :  { %s93_s14 = scalar_lea.vmem %s25_s13, 64  ;;  %p98_p1 = scmp.lt.s32.totalorder %s25_s13, %s25_s13 }
   0x6   :  { %p94_p0 = scmp.ne.s32.totalorder %s25_s13, %s93_s14  ;;  %p99_p2 = scmp.lt.s32.totalorder %s93_s14, %s93_s14 }
   0x8   :  { %p100_p3 = por %p99_p2, %p98_p1 }
   0xa   :  { %p101_p4 = pnand %p100_p3, %p94_p0 }
   0xc   :  { %104 = shalt.err (!%p101_p4)
}
   0xd   :  { %27 = dma.hbm_to_vmem [thread:$0]  %s159_s1, 64, %s25_s13, [#allocation3]  }
   0xe   :  { %125 = dma.done.wait [#allocation5], 16  }
   0xf   :  { %126 = vsyncadd [#allocation5], 4294967280 }
  0x10   :  { %127 = dma.done.wait [#allocation3], 64  }
  0x11   :  { %128 = vsyncadd [#allocation3], 4294967232 }
  0x12   :  { %34 = sfence }
  0x13   :  { %s35_s0 = sld [smem:[#allocation2]]  ;;  %v37_v0 = vld [vmem:[#allocation6] sm:$0xf]  ;;  %v48_v9 = vlaneseq  ;;  %s133_s1 = smov [#allocation7]  }
  0x14   :  { %s69_s17 = sld [smem:[#allocation2 + $0x1]]  ;;  %s59_s18 = sshll.u32 %s133_s1, 4  ;;  %s60_s18 = int_to_ptr.vmem [resolvable:$true] %s59_s18 }
  0x15   :  { %vm50_vm0 = vcmp.lt.s32.totalorder %v48_v9, 512  ;;  %s105_s19 = scalar_lea.vmem %s60_s18, 64  ;;  %p110_p6 = scmp.lt.s32.totalorder %s60_s18, %s60_s18 }
  0x16   :  { %p106_p5 = scmp.ne.s32.totalorder %s60_s18, %s105_s19  ;;  %p111_p7 = scmp.lt.s32.totalorder %s105_s19, %s105_s19 }
  0x18   :  { %p112_p8 = por %p111_p7, %p110_p6 }
  0x19   :  { %v38_v1 = vstv %s35_s0 }
  0x1a   :  { %v39_v2 = vmul.f32 %v38_v1, %v37_v0  ;;  %v40_v3 = vstv %s69_s17  ;;  %p113_p9 = pnand %p112_p8, %p106_p5 }
  0x1c   :  { %v41_v4 = vadd.f32 %v40_v3, %v39_v2 }
  0x1e   :  { %v42_v5 = vsub.f32 0.0, %v41_v4 }
  0x20   :  { %v43_v6 = vmul.f32 1.442695, %v42_v5 }
  0x22   :  { %73 = vpow2.f32 %v43_v6 }
  0x2f   :  { %v74_v7 = vpop.eup %73 }
  0x30   :  { %v45_v8 = vadd.f32 1.0, %v74_v7 }
  0x32   :  { %75 = vrcp.f32 %v45_v8 }
  0x3f   :  { %v76_v10 = vpop.eup %75 }
  0x40   :  { %52 = vst.msk [vmem:[#allocation7] sm:$0xf] %vm50_vm0, %v76_v10 }
  0x41   :  { %116 = shalt.err (!%p113_p9)
}
  0x42   :  { %62 = dma.vmem_to_hbm [thread:$0]  %s60_s18, 64, %s160_s2, [#allocation4]  }
  0x43   :  { %129 = dma.done.wait [#allocation4], 64  }
  0x44   :  { %130 = vsyncadd [#allocation4], 4294967232 }
  0x45   :  { %66 = vsyncpa [#allocation3], 1 }
  0x46   :  { %67 = vsyncpa [#allocation4], 1 }
  0x47   :  { %68 = vsyncpa [#allocation5], 1 }

</bundles_post_ra>
